<compile_context>
chip_gen: v5e
topology: v5e:2x2
jax: 0.10.0
libtpu: 0.0.40
codegen_flags: <defaults>
</compile_context>

<pallas_src>
import jax
import jax.numpy as jnp
from jax.experimental import pallas as pl
from jax.experimental.pallas import tpu as pltpu


def generator_kernel(x_ref, w1_ref, b1_ref, w2_ref, b2_ref, w3_ref, b3_ref,
                     o_ref):
    # x block: (TB, D) f32. Weights: bf16 (in, out), resident in VMEM across
    # all grid steps. Biases: f32 (1, out).
    x = x_ref[...].astype(jnp.bfloat16)  # cast only for the MXU operand

    # Layer 1: Linear(D, 256) + ReLU  (bf16 operands, f32 accumulation)
    h = jnp.dot(x, w1_ref[...], preferred_element_type=jnp.float32)
    h = jnp.maximum(h + b1_ref[...], 0.0)

    # Layer 2: Linear(256, 256) + ReLU
    h = jnp.dot(h.astype(jnp.bfloat16), w2_ref[...],
                preferred_element_type=jnp.float32)
    h = jnp.maximum(h + b2_ref[...], 0.0)

    # Layer 3: Linear(256, output_size) + Tanh (Tanh in f32 on the EUP)
    h = jnp.dot(h.astype(jnp.bfloat16), w3_ref[...],
                preferred_element_type=jnp.float32)
    o_ref[...] = jnp.tanh(h + b3_ref[...]).astype(o_ref.dtype)


def generator_forward(x, params, *, tb=128):
    """x: (B, D) float32. params: dict of w1,b1,w2,b2,w3,b3
    (weights (in, out) bf16, biases (1, out) f32)."""
    B, D = x.shape
    H = params["w1"].shape[1]
    O = params["w3"].shape[1]

    # Batch tile: big enough to pipeline the x/out DMA, small enough that the
    # double-buffered (TB, D) + (TB, O) f32 blocks plus ~0.25 MiB of resident
    # weights stay far below v7x's 32 MiB default scoped-VMEM limit.
    tb = min(tb, B)
    if tb != B:
        tb = max(8, (tb // 8) * 8)  # sublane (8) alignment for partial tiles
    grid = (pl.cdiv(B, tb),)

    flops = 2 * B * (D * H + H * H + H * O)
    bytes_accessed = (4 * (B * D + B * O)            # x in, out
                      + 2 * (D * H + H * H + H * O)  # bf16 weights
                      + 4 * (2 * H + O))             # f32 biases
    cost = pl.CostEstimate(flops=flops, transcendentals=B * O,
                           bytes_accessed=bytes_accessed)

    const = lambda i: (0, 0)  # weights/biases: same block every step -> resident
    return pl.pallas_call(
        generator_kernel,
        out_shape=jax.ShapeDtypeStruct((B, O), jnp.float32),
        grid=grid,
        in_specs=[
            pl.BlockSpec((tb, D), lambda i: (i, 0)),  # x: batch-tiled
            pl.BlockSpec((D, H), const),              # w1
            pl.BlockSpec((1, H), const),              # b1
            pl.BlockSpec((H, H), const),              # w2
            pl.BlockSpec((1, H), const),              # b2
            pl.BlockSpec((H, O), const),              # w3
            pl.BlockSpec((1, O), const),              # b3
        ],
        out_specs=pl.BlockSpec((tb, O), lambda i: (i, 0)),
        compiler_params=pltpu.CompilerParams(
            dimension_semantics=("parallel",)),  # shards batch over v7x's 2 TCs
        cost_estimate=cost,
    )(x, params["w1"], params["b1"], params["w2"], params["b2"],
      params["w3"], params["b3"])


def init_params(key, input_size, output_size, hidden=256):
    """PyTorch default Linear init: U(-1/sqrt(fan_in), 1/sqrt(fan_in)).
    Weights stored transposed as (in, out) and cast to bf16 (MXU-native);
    biases kept f32 as (1, out)."""
    def layer(k, fan_in, fan_out):
        kw, kb = jax.random.split(k)
        bound = 1.0 / jnp.sqrt(fan_in)
        w = jax.random.uniform(kw, (fan_in, fan_out), jnp.float32, -bound, bound)
        b = jax.random.uniform(kb, (1, fan_out), jnp.float32, -bound, bound)
        return w.astype(jnp.bfloat16), b

    k1, k2, k3 = jax.random.split(key, 3)
    w1, b1 = layer(k1, input_size, hidden)
    w2, b2 = layer(k2, hidden, hidden)
    w3, b3 = layer(k3, hidden, output_size)
    return {"w1": w1, "b1": b1, "w2": w2, "b2": b2, "w3": w3, "b3": b3}


def reference_forward(x, params):
    """Pure-JAX f32 reference (same bf16-rounded weight values, f32 math)."""
    w1 = params["w1"].astype(jnp.float32)
    w2 = params["w2"].astype(jnp.float32)
    w3 = params["w3"].astype(jnp.float32)
    h = jnp.maximum(x @ w1 + params["b1"], 0.0)
    h = jnp.maximum(h @ w2 + params["b2"], 0.0)
    return jnp.tanh(h @ w3 + params["b3"])


if __name__ == "__main__":
    key = jax.random.PRNGKey(0)
    k_param, k_x = jax.random.split(key)

    batch = 256        # small but enough to exercise the batch-tiled grid (2 steps)
    input_size = 64    # latent dim
    output_size = 128  # lane-dense output width

    params = init_params(k_param, input_size, output_size)
    x = jax.random.normal(k_x, (batch, input_size), jnp.float32)

    out = generator_forward(x, params, tb=128)
    out = jax.block_until_ready(out)

    ref = reference_forward(x, params)
    assert out.shape == (batch, output_size)
    # bf16 matmul operands (f32 accumulation) vs f32 reference: loose tolerance.
    assert jnp.allclose(out, ref, atol=2e-2, rtol=2e-2), "mismatch vs reference"

    print("KERNEL_OK")
</pallas_src>

<mosaic_0001>
module attributes {stable_mosaic.version = 11 : i64} {
  func.func @generator_kernel(%arg0: i32, %arg1: memref<128x64xf32, #tpu.memory_space<vmem>>, %arg2: memref<64x256xbf16, #tpu.memory_space<vmem>>, %arg3: memref<1x256xf32, #tpu.memory_space<vmem>>, %arg4: memref<256x256xbf16, #tpu.memory_space<vmem>>, %arg5: memref<1x256xf32, #tpu.memory_space<vmem>>, %arg6: memref<256x128xbf16, #tpu.memory_space<vmem>>, %arg7: memref<1x128xf32, #tpu.memory_space<vmem>>, %arg8: memref<128x128xf32, #tpu.memory_space<vmem>>) attributes {dimension_semantics = [#tpu.dimension_semantics<parallel>], iteration_bounds = array<i64: 2>, scalar_prefetch = 0 : i64, scratch_operands = 0 : i64, tpu.core_type = #tpu.core_type<tc>, window_params = [{transform_indices = @transform_0, window_bounds = array<i64: 128, 64>}, {pipeline_mode = #tpu.pipeline_mode<synchronous>, transform_indices = @transform_1, window_bounds = array<i64: 64, 256>}, {pipeline_mode = #tpu.pipeline_mode<synchronous>, transform_indices = @transform_2, window_bounds = array<i64: 1, 256>}, {pipeline_mode = #tpu.pipeline_mode<synchronous>, transform_indices = @transform_3, window_bounds = array<i64: 256, 256>}, {pipeline_mode = #tpu.pipeline_mode<synchronous>, transform_indices = @transform_4, window_bounds = array<i64: 1, 256>}, {pipeline_mode = #tpu.pipeline_mode<synchronous>, transform_indices = @transform_5, window_bounds = array<i64: 256, 128>}, {pipeline_mode = #tpu.pipeline_mode<synchronous>, transform_indices = @transform_6, window_bounds = array<i64: 1, 128>}, {transform_indices = @transform_7, window_bounds = array<i64: 128, 128>}]} {
    %c0 = arith.constant 0 : index
    %c0_0 = arith.constant 0 : index
    %0 = vector.load %arg1[%c0, %c0_0] : memref<128x64xf32, #tpu.memory_space<vmem>>, vector<128x64xf32>
    %1 = arith.truncf %0 : vector<128x64xf32> to vector<128x64xbf16>
    %c0_1 = arith.constant 0 : index
    %c0_2 = arith.constant 0 : index
    %2 = vector.load %arg2[%c0_1, %c0_2] : memref<64x256xbf16, #tpu.memory_space<vmem>>, vector<64x256xbf16>
    %cst = arith.constant dense<0.000000e+00> : vector<128x256xf32>
    %3 = tpu.matmul %1, %2, %cst {dimension_numbers = #tpu.dot_dimension_numbers<[1], [0], [0], [1], [0, 0, 1, 1], [], []>} : vector<128x64xbf16>, vector<64x256xbf16>, vector<128x256xf32> -> vector<128x256xf32>
    %c0_3 = arith.constant 0 : index
    %c0_4 = arith.constant 0 : index
    %4 = vector.load %arg3[%c0_3, %c0_4] : memref<1x256xf32, #tpu.memory_space<vmem>>, vector<1x256xf32>
    %5 = vector.broadcast %4 : vector<1x256xf32> to vector<128x256xf32>
    %6 = arith.addf %3, %5 : vector<128x256xf32>
    %cst_5 = arith.constant 0.000000e+00 : f32
    %7 = vector.broadcast %cst_5 : f32 to vector<128x256xf32>
    %8 = arith.maximumf %6, %7 : vector<128x256xf32>
    %9 = arith.truncf %8 : vector<128x256xf32> to vector<128x256xbf16>
    %c0_6 = arith.constant 0 : index
    %c0_7 = arith.constant 0 : index
    %10 = vector.load %arg4[%c0_6, %c0_7] : memref<256x256xbf16, #tpu.memory_space<vmem>>, vector<256x256xbf16>
    %cst_8 = arith.constant dense<0.000000e+00> : vector<128x256xf32>
    %11 = tpu.matmul %9, %10, %cst_8 {dimension_numbers = #tpu.dot_dimension_numbers<[1], [0], [0], [1], [0, 0, 1, 1], [], []>} : vector<128x256xbf16>, vector<256x256xbf16>, vector<128x256xf32> -> vector<128x256xf32>
    %c0_9 = arith.constant 0 : index
    %c0_10 = arith.constant 0 : index
    %12 = vector.load %arg5[%c0_9, %c0_10] : memref<1x256xf32, #tpu.memory_space<vmem>>, vector<1x256xf32>
    %13 = vector.broadcast %12 : vector<1x256xf32> to vector<128x256xf32>
    %14 = arith.addf %11, %13 : vector<128x256xf32>
    %cst_11 = arith.constant 0.000000e+00 : f32
    %15 = vector.broadcast %cst_11 : f32 to vector<128x256xf32>
    %16 = arith.maximumf %14, %15 : vector<128x256xf32>
    %17 = arith.truncf %16 : vector<128x256xf32> to vector<128x256xbf16>
    %c0_12 = arith.constant 0 : index
    %c0_13 = arith.constant 0 : index
    %18 = vector.load %arg6[%c0_12, %c0_13] : memref<256x128xbf16, #tpu.memory_space<vmem>>, vector<256x128xbf16>
    %cst_14 = arith.constant dense<0.000000e+00> : vector<128x128xf32>
    %19 = tpu.matmul %17, %18, %cst_14 {dimension_numbers = #tpu.dot_dimension_numbers<[1], [0], [0], [1], [0, 0, 1, 1], [], []>} : vector<128x256xbf16>, vector<256x128xbf16>, vector<128x128xf32> -> vector<128x128xf32>
    %c0_15 = arith.constant 0 : index
    %c0_16 = arith.constant 0 : index
    %20 = vector.load %arg7[%c0_15, %c0_16] : memref<1x128xf32, #tpu.memory_space<vmem>>, vector<1x128xf32>
    %21 = vector.broadcast %20 : vector<1x128xf32> to vector<128x128xf32>
    %22 = arith.addf %19, %21 : vector<128x128xf32>
    %23 = math.tanh %22 : vector<128x128xf32>
    %c0_17 = arith.constant 0 : index
    %c0_18 = arith.constant 0 : index
    %24 = vector.load %arg8[%c0_17, %c0_18] : memref<128x128xf32, #tpu.memory_space<vmem>>, vector<128x128xf32>
    tpu.vector_store %arg8[%c0_17, %c0_18], %23 {strides = array<i32>} : memref<128x128xf32, #tpu.memory_space<vmem>>, vector<128x128xf32>,
    return
  }
  func.func @transform_0(%arg0: i32) -> (i32, i32) {
    %c0_i32 = arith.constant 0 : i32
    %c0_i32_0 = arith.constant 0 : i32
    return %arg0, %c0_i32 : i32, i32
  }
  func.func @transform_1(%arg0: i32) -> (i32, i32) {
    %c0_i32 = arith.constant 0 : i32
    %c0_i32_0 = arith.constant 0 : i32
    %c0_i32_1 = arith.constant 0 : i32
    return %c0_i32, %c0_i32_0 : i32, i32
  }
  func.func @transform_2(%arg0: i32) -> (i32, i32) {
    %c0_i32 = arith.constant 0 : i32
    %c0_i32_0 = arith.constant 0 : i32
    %c0_i32_1 = arith.constant 0 : i32
    return %c0_i32, %c0_i32_0 : i32, i32
  }
  func.func @transform_3(%arg0: i32) -> (i32, i32) {
    %c0_i32 = arith.constant 0 : i32
    %c0_i32_0 = arith.constant 0 : i32
    %c0_i32_1 = arith.constant 0 : i32
    return %c0_i32, %c0_i32_0 : i32, i32
  }
  func.func @transform_4(%arg0: i32) -> (i32, i32) {
    %c0_i32 = arith.constant 0 : i32
    %c0_i32_0 = arith.constant 0 : i32
    %c0_i32_1 = arith.constant 0 : i32
    return %c0_i32, %c0_i32_0 : i32, i32
  }
  func.func @transform_5(%arg0: i32) -> (i32, i32) {
    %c0_i32 = arith.constant 0 : i32
    %c0_i32_0 = arith.constant 0 : i32
    %c0_i32_1 = arith.constant 0 : i32
    return %c0_i32, %c0_i32_0 : i32, i32
  }
  func.func @transform_6(%arg0: i32) -> (i32, i32) {
    %c0_i32 = arith.constant 0 : i32
    %c0_i32_0 = arith.constant 0 : i32
    %c0_i32_1 = arith.constant 0 : i32
    return %c0_i32, %c0_i32_0 : i32, i32
  }
  func.func @transform_7(%arg0: i32) -> (i32, i32) {
    %c0_i32 = arith.constant 0 : i32
    %c0_i32_0 = arith.constant 0 : i32
    return %arg0, %c0_i32 : i32, i32
  }
}

</mosaic_0001>

<bundles_post_ra>
// kernel: tpu_custom_call.1
= control target key start
LH: loop header
LB: loop body
LE: loop exit
PB: predicated region body
PF: predicated region fallthrough
CT: control target
= control target key end

     0   :  { %12 = vsyncpa [#allocation3], 0  ;;  %s2456_s0 = inlined_call_operand.vmem [shape: f32[256,64], index: 0, kind: input, shape index: {}]   ;;  %s2457_s1 = inlined_call_operand.hbm [shape: bf16[64,256], index: 1, kind: input, shape index: {}]   ;;  %s2458_s2 = inlined_call_operand.vmem [shape: f32[1,256], index: 2, kind: input, shape index: {}]   ;;  %s2459_s3 = inlined_call_operand.vmem [shape: bf16[256,256], index: 3, kind: input, shape index: {}]   ;;  %s2460_s4 = inlined_call_operand.hbm [shape: f32[1,256], index: 4, kind: input, shape index: {}]   ;;  %s2461_s5 = inlined_call_operand.vmem [shape: bf16[256,128], index: 5, kind: input, shape index: {}]   ;;  %s2462_s6 = inlined_call_operand.vmem [shape: f32[1,128], index: 6, kind: input, shape index: {}]   ;;  %s2463_s7 = inlined_call_operand.hbm [shape: f32[256,128], index: 7, kind: output, shape index: {}]  }
   0x1   :  { %13 = vsyncpa [#allocation6], 0 }
   0x2   :  { %14 = vsyncpa [#allocation4], 0 }
   0x3   :  { %16 = vsyncpa [#allocation4 + $0x1], 0  ;;  %s1954_s24 = smov 0   ;;  %s1956_s25 = smov 0  }
   0x4   :  { %s1958_s26 = smov 0   ;;  %s1960_s27 = smov 0  }
   0x5 LB: > { %s1975_s28 = sadd.s32 4294967295, %s1906_s27   ;;  %s1366_s29 = sadd.s32 4294967294, %s1906_s27   ;;  %s1906_s27 = sphi %s1960_s27, %s2470_s27   ;;  %s1902_s26 = sphi %s1958_s26, %s2469_s26   ;;  %s1898_s25 = sphi %s1956_s25, %s2468_s25   ;;  %s1894_s24 = sphi %s1954_s24, %s2467_s24  }
   0x6   : > { %s1979_s30 = sadd.s32 1, %s1906_s27   ;;  %s181_s8 = sadd.s32 1, %s1902_s26 }
   0x7   : > { %s178_s9 = ssub.s32 %s1906_s27, %s1979_s30  ;;  %p191_p0 = scmp.ne.s32.totalorder %s1902_s26, %s1898_s25 }
   0x8   : > { %p179_p1 = scmp.eq.s32.totalorder %s178_s9, 0  ;;  %p192_p2 = scmp.eq.s32.totalorder %s1975_s28, 1 }
   0x9   : > { %p197_p3 = scmp.ne.s32.totalorder %s1898_s25, %s1894_s24  ;;  %p198_p4 = scmp.eq.s32.totalorder %s1366_s29, 1 }
   0xa   : > { %s1990_s10 = scalar_select %p179_p1, %s1902_s26, %s181_s8  }
   0xb   : > { %p1992_p5 = por %p192_p2, %p191_p0  ;;  %p1996_p6 = por %p198_p4, %p197_p3 }
   0xc   : > { %p1367_p7 = scmp.ge.s32.totalorder %s1906_s27, 1  ;;  %p205_p8 = scmp.lt.s32.totalorder %s1906_s27, 3 }
   0xd   : > { %p1700_p9 = scmp.eq.s32.totalorder %s1975_s28, 0  ;;  %s216_s16 = sshll.u32 %s2457_s1, 4  ;;  %s217_s16 = int_to_ptr.hbm [resolvable:$true] %s216_s16 }
   0xe   : > { %p2003_p10 = pnand %p1367_p7, %p205_p8  ;;  %s1908_s17 = smov [#allocation2]  }
   0xf   : > { %s218_s18 = sshll.u32 %s1908_s17, 4  ;;  %s237_s21 = sshll.u32 %s2460_s4, 4  ;;  %s219_s18 = int_to_ptr.vmem [resolvable:$true] %s218_s18  ;;  %s238_s21 = int_to_ptr.hbm [resolvable:$true] %s237_s21 }
  0x10   : > { %p1689_p11 = pneg %p2003_p10  ;;  %s1909_s22 = smov 128  }
  0x11   : > { %s1910_s23 = smov 8   ;;  %s1911_s29 = smov [#allocation5]  }
  0x12   : > { %p1690_p12 = pnand %p1700_p9, %p1689_p11  ;;  %s239_s8 = sshll.u32 %s1911_s29, 4  ;;  %s240_s8 = int_to_ptr.vmem [resolvable:$true] %s239_s8 }
  0x13   : > { %267 = sbr.rel (%p2003_p10) target bundleno = 601 (0x259), region = 48 }
  0x14   : > { %1692 = dma.hbm_to_vmem [thread:$0]  (!%p1690_p12), %s217_s16, 1024, %s219_s18, [#allocation3], %s1909_s22, %s1909_s22, %s1910_s23  }
  0x15   : > { %1695 = dma.hbm_to_vmem [thread:$0]  (!%p1690_p12), %s238_s21, 32, %s240_s8, [#allocation6]  }
  0x18   : > { %1881 = dma.done.wait (%p1700_p9), [#allocation3], 1024  }
  0x19   : > { %1883 = vsyncadd (%p1700_p9), [#allocation3], 4294966272 }
  0x1a   : > { %1885 = dma.done.wait (%p1700_p9), [#allocation6], 32  }
  0x1b   : > { %1887 = vsyncadd (%p1700_p9), [#allocation6], 4294967264  ;;  %s1375_s9 = sshll.u32 %s1975_s28, 4  ;;  %v1403_v0 = vld [vmem:[#allocation2 + $0x30] sm:$0xf]  ;;  %vm391_vm0 = vcmask 523264  }
  0x1c   : > { %p306_p13 = scmp.lt.s32.totalorder %s1375_s9, 31  ;;  %v1629_v1 = vld [vmem:[#allocation2 + $0x34] sm:$0xf0]  ;;  %v1628_v2 = vld [vmem:[#allocation2 + $0x34] sm:$0xf]  ;;  %s302_s22 = sand.u32 1, %s1898_s25  }
  0x1d   : > { %v1404_v3 = vor.u32 %v1629_v1, %v1403_v0  ;;  %v1405_v4 = vld [vmem:[#allocation2 + $0x38] sm:$0xf0]  ;;  %v1395_v5 = vld [vmem:[#allocation2 + $0x20] sm:$0xf]  ;;  %v1627_v6 = vld [vmem:[#allocation2 + $0x24] sm:$0xf0] }
  0x1e   : > { %s2472_s9 = smov (!%p306_p13, %s1375_s9), 31  ;;  %v1408_v7 = vor.u32 %v1628_v2, %v1405_v4  ;;  %v1626_v8 = vld [vmem:[#allocation2 + $0x24] sm:$0xf]  ;;  %v1397_v9 = vld [vmem:[#allocation2 + $0x28] sm:$0xf0]  ;;  %v1396_v10 = vor.u32 %v1627_v6, %v1395_v5  ;;  %s1374_s23 = sshll.u32 %s302_s22, 7 }
  0x1f   : > { %420 = vmatpush.bf16.msra.mxu0 %v1404_v3  ;;  %v1400_v11 = vor.u32 %v1626_v8, %v1397_v9  ;;  %v1387_v12 = vld [vmem:[#allocation2 + $0x10] sm:$0xf]  ;;  %v1625_v13 = vld [vmem:[#allocation2 + $0x14] sm:$0xf0]  ;;  %v1624_v14 = vld [vmem:[#allocation2 + $0x14] sm:$0xf] }
  0x20   : > { %469 = vmatpush.bf16.msra.mxu1 %v1408_v7  ;;  %v1389_v15 = vld [vmem:[#allocation2 + $0x18] sm:$0xf0]  ;;  %s1376_s13 = sshll.u32 %s2472_s9, 3  ;;  %v1388_v16 = vor.u32 %v1625_v13, %v1387_v12  ;;  %v1379_v17 = vld [vmem:[#allocation2] sm:$0xf]  ;;  %s2390_s29 = scalar_lea.vmem [#allocation7], %s1374_s23 }
  0x21   : > { %v1392_v18 = vor.u32 %v1624_v14, %v1389_v15  ;;  %v1623_v19 = vld [vmem:[#allocation2 + $0x4] sm:$0xf0]  ;;  %v1622_v20 = vld [vmem:[#allocation2 + $0x4] sm:$0xf]  ;;  %s2031_s16 = scalar_lea.vmem %s2456_s0, %s1376_s13  ;;  %v1381_v21 = vld [vmem:[#allocation2 + $0x8] sm:$0xf0] }
  0x22   : > { %v1644_v22 = vld [vmem:[%s2459_s3 + $0x74] sm:$0xf]  ;;  %v1485_v23 = vld [vmem:[%s2459_s3 + $0x78] sm:$0xf0]  ;;  %v1380_v26 = vor.u32 %v1623_v19, %v1379_v17  ;;  %v313_v27 = vld [vmem:[%s2031_s16] sm:$0xff]  ;;  %v1384_v29 = vor.u32 %v1622_v20, %v1381_v21  ;;  %s1678_s8 = sshll.u32 %s1975_s28, 7 }
  0x23   : > { %421 = vmatpush.bf16.msra.mxu0 %v1396_v10  ;;  %v1660_v24 = vld [vmem:[%s2459_s3 + $0xf4] sm:$0xf]  ;;  %v1549_v25 = vld [vmem:[%s2459_s3 + $0xf8] sm:$0xf0]  ;;  %v314_v28 = vld [vmem:[%s2031_s16 + $0x8] sm:$0xff]  ;;  %v1488_v30 = vor.u32 %v1644_v22, %v1485_v23  ;;  %s1278_s14 = scalar_lea.hbm %s2463_s7, %s1678_s8  ;;  %s1279_s15 = sshll.u32 %s2390_s29, 4  ;;  %s1280_s15 = int_to_ptr.vmem [resolvable:$true] %s1279_s15 }
  0x24   : > { %470 = vmatpush.bf16.msra.mxu1 %v1400_v11  ;;  %v1552_v31 = vor.u32 %v1660_v24, %v1549_v25  ;;  %v329_v32 = vpack.c.bf16 %v314_v28, %v313_v27  ;;  %v1642_v33 = vld [vmem:[%s2459_s3 + $0x64] sm:$0xf]  ;;  %v1477_v34 = vld [vmem:[%s2459_s3 + $0x68] sm:$0xf0]  ;;  %v315_v39 = vld [vmem:[%s2031_s16 + $0x10] sm:$0xff]  ;;  %s1267_s28 = scalar_lea.sflag [#allocation4], %s302_s22 }
  0x25   : > { %v1658_v35 = vld [vmem:[%s2459_s3 + $0xe4] sm:$0xf]  ;;  %v1480_v36 = vor.u32 %v1642_v33, %v1477_v34  ;;  %v1541_v37 = vld [vmem:[%s2459_s3 + $0xe8] sm:$0xf0]  ;;  %v316_v40 = vld [vmem:[%s2031_s16 + $0x18] sm:$0xff]  ;;  %s1856_s21 = scalar_lea.hbm %s2463_s7, 256 }
  0x26   : > { %v1544_v38 = vor.u32 %v1658_v35, %v1541_v37  ;;  %v330_v41 = vpack.c.bf16 %v316_v40, %v315_v39  ;;  %v1640_v42 = vld [vmem:[%s2459_s3 + $0x54] sm:$0xf]  ;;  %v1469_v43 = vld [vmem:[%s2459_s3 + $0x58] sm:$0xf0]  ;;  %v317_v48 = vld [vmem:[%s2031_s16 + $0x20] sm:$0xff] }
  0x27   : > { %422 = vmatpush.bf16.msra.mxu0 %v1388_v16  ;;  %v1656_v44 = vld [vmem:[%s2459_s3 + $0xd4] sm:$0xf]  ;;  %v1472_v45 = vor.u32 %v1640_v42, %v1469_v43  ;;  %v1533_v46 = vld [vmem:[%s2459_s3 + $0xd8] sm:$0xf0]  ;;  %v318_v49 = vld [vmem:[%s2031_s16 + $0x28] sm:$0xff] }
  0x28   : > { %471 = vmatpush.bf16.msra.mxu1 %v1392_v18  ;;  %v1536_v47 = vor.u32 %v1656_v44, %v1533_v46  ;;  %v331_v50 = vpack.c.bf16 %v318_v49, %v317_v48  ;;  %v1638_v51 = vld [vmem:[%s2459_s3 + $0x44] sm:$0xf]  ;;  %v1461_v52 = vld [vmem:[%s2459_s3 + $0x48] sm:$0xf0]  ;;  %v319_v57 = vld [vmem:[%s2031_s16 + $0x30] sm:$0xff] }
  0x29   : > { %v1654_v53 = vld [vmem:[%s2459_s3 + $0xc4] sm:$0xf]  ;;  %v1464_v54 = vor.u32 %v1638_v51, %v1461_v52  ;;  %v1525_v55 = vld [vmem:[%s2459_s3 + $0xc8] sm:$0xf0]  ;;  %v320_v58 = vld [vmem:[%s2031_s16 + $0x38] sm:$0xff] }
  0x2a   : > { %v1528_v56 = vor.u32 %v1654_v53, %v1525_v55  ;;  %v332_v59 = vpack.c.bf16 %v320_v58, %v319_v57  ;;  %v1636_v60 = vld [vmem:[%s2459_s3 + $0x34] sm:$0xf]  ;;  %v1453_v61 = vld [vmem:[%s2459_s3 + $0x38] sm:$0xf0]  ;;  %v321_v2 = vld [vmem:[%s2031_s16 + $0x40] sm:$0xff] }
  0x2b   : > { %423 = vmatpush.bf16.msra.mxu0 %v1380_v26  ;;  %v1652_v62 = vld [vmem:[%s2459_s3 + $0xb4] sm:$0xf]  ;;  %v1456_v63 = vor.u32 %v1636_v60, %v1453_v61  ;;  %v1517_v0 = vld [vmem:[%s2459_s3 + $0xb8] sm:$0xf0]  ;;  %v322_v3 = vld [vmem:[%s2031_s16 + $0x48] sm:$0xff] }
  0x2c   : > { %472 = vmatpush.bf16.msra.mxu1 %v1384_v29  ;;  %v1520_v1 = vor.u32 %v1652_v62, %v1517_v0  ;;  %v333_v4 = vpack.c.bf16 %v322_v3, %v321_v2  ;;  %v1634_v5 = vld [vmem:[%s2459_s3 + $0x24] sm:$0xf]  ;;  %v1445_v6 = vld [vmem:[%s2459_s3 + $0x28] sm:$0xf0]  ;;  %v1483_v10 = vld [vmem:[%s2459_s3 + $0x70] sm:$0xf] }
  0x2d   : > { %v1650_v7 = vld [vmem:[%s2459_s3 + $0xa4] sm:$0xf]  ;;  %v1448_v8 = vor.u32 %v1634_v5, %v1445_v6  ;;  %v1509_v9 = vld [vmem:[%s2459_s3 + $0xa8] sm:$0xf0]  ;;  %v1645_v11 = vld [vmem:[%s2459_s3 + $0x74] sm:$0xf0] }
  0x2e   : > { %1409 = vmatmul.msk.bf16.vlgmr.msra.gmra.mxu0 %vm391_vm0, %v329_v32  ;;  %v1512_v12 = vor.u32 %v1650_v7, %v1509_v9  ;;  %v1484_v13 = vor.u32 %v1645_v11, %v1483_v10  ;;  %v1547_v14 = vld [vmem:[%s2459_s3 + $0xf0] sm:$0xf]  ;;  %v1661_v15 = vld [vmem:[%s2459_s3 + $0xf4] sm:$0xf0]  ;;  %v1475_v20 = vld [vmem:[%s2459_s3 + $0x60] sm:$0xf] }
  0x2f   : > { %858 = vmatpush.bf16.msrb.mxu0 %v1488_v30  ;;  %1417 = vmatmul.msk.bf16.vlgmr.msra.gmra.mxu1 %vm391_vm0, %v329_v32  ;;  %v1548_v16 = vor.u32 %v1661_v15, %v1547_v14  ;;  %v323_v17 = vld [vmem:[%s2031_s16 + $0x50] sm:$0xff]  ;;  %v324_v18 = vld [vmem:[%s2031_s16 + $0x58] sm:$0xff]  ;;  %v1643_v21 = vld [vmem:[%s2459_s3 + $0x64] sm:$0xf0] }
  0x30   : > { %907 = vmatpush.bf16.msrb.mxu1 %v1552_v31  ;;  %760 = vmatpush.bf16.msra.mxu2 %v1484_v13  ;;  %v334_v19 = vpack.c.bf16 %v324_v18, %v323_v17  ;;  %v1539_v22 = vld [vmem:[%s2459_s3 + $0xe0] sm:$0xf]  ;;  %v1476_v23 = vor.u32 %v1643_v21, %v1475_v20  ;;  %v1659_v24 = vld [vmem:[%s2459_s3 + $0xe4] sm:$0xf0]  ;;  %v1632_v26 = vld [vmem:[%s2459_s3 + $0x14] sm:$0xf] }
  0x31   : > { %809 = vmatpush.bf16.msra.mxu3 %v1548_v16  ;;  %v1540_v25 = vor.u32 %v1659_v24, %v1539_v22  ;;  %v1437_v27 = vld [vmem:[%s2459_s3 + $0x18] sm:$0xf0]  ;;  %v1467_v28 = vld [vmem:[%s2459_s3 + $0x50] sm:$0xf]  ;;  %v1641_v30 = vld [vmem:[%s2459_s3 + $0x54] sm:$0xf0] }
  0x32   : > { %v1440_v29 = vor.u32 %v1632_v26, %v1437_v27  ;;  %v1531_v31 = vld [vmem:[%s2459_s3 + $0xd0] sm:$0xf]  ;;  %v1657_v32 = vld [vmem:[%s2459_s3 + $0xd4] sm:$0xf0]  ;;  %v1468_v33 = vor.u32 %v1641_v30, %v1467_v28  ;;  %v1648_v35 = vld [vmem:[%s2459_s3 + $0x94] sm:$0xf] }
  0x33   : > { %859 = vmatpush.bf16.msrb.mxu0 %v1480_v36  ;;  %v1532_v34 = vor.u32 %v1657_v32, %v1531_v31  ;;  %v1501_v36 = vld [vmem:[%s2459_s3 + $0x98] sm:$0xf0]  ;;  %v1459_v37 = vld [vmem:[%s2459_s3 + $0x40] sm:$0xf]  ;;  %v1639_v39 = vld [vmem:[%s2459_s3 + $0x44] sm:$0xf0] }
  0x34   : > { %908 = vmatpush.bf16.msrb.mxu1 %v1544_v38  ;;  %761 = vmatpush.bf16.msra.mxu2 %v1476_v23  ;;  %v1504_v38 = vor.u32 %v1648_v35, %v1501_v36  ;;  %v1523_v40 = vld [vmem:[%s2459_s3 + $0xc0] sm:$0xf]  ;;  %v1460_v42 = vor.u32 %v1639_v39, %v1459_v37  ;;  %v1451_v46 = vld [vmem:[%s2459_s3 + $0x30] sm:$0xf]  ;;  %v1653_v51 = vld [vmem:[%s2459_s3 + $0xb4] sm:$0xf0] }
  0x35   : > { %810 = vmatpush.bf16.msra.mxu3 %v1540_v25  ;;  %v325_v44 = vld [vmem:[%s2031_s16 + $0x60] sm:$0xff]  ;;  %v1515_v48 = vld [vmem:[%s2459_s3 + $0xb0] sm:$0xf]  ;;  %v1651_v57 = vld [vmem:[%s2459_s3 + $0xa4] sm:$0xf0] }
  0x36   : > { %v1516_v52 = vor.u32 %v1653_v51, %v1515_v48  ;;  %v1443_v53 = vld [vmem:[%s2459_s3 + $0x20] sm:$0xf]  ;;  %v1429_v60 = vld [vmem:[%s2459_s3 + $0x8] sm:$0xf0]  ;;  %v1435_v62 = vld [vmem:[%s2459_s3 + $0x10] sm:$0xf] }
  0x37   : > { %860 = vmatpush.bf16.msrb.mxu0 %v1472_v45  ;;  %v326_v45 = vld [vmem:[%s2031_s16 + $0x68] sm:$0xff]  ;;  %v1499_v0 = vld [vmem:[%s2459_s3 + $0x90] sm:$0xf]  ;;  %v1649_v2 = vld [vmem:[%s2459_s3 + $0x94] sm:$0xf0] }
  0x38   : > { %909 = vmatpush.bf16.msrb.mxu1 %v1536_v47  ;;  %762 = vmatpush.bf16.msra.mxu2 %v1468_v33  ;;  %v1637_v47 = vld [vmem:[%s2459_s3 + $0x34] sm:$0xf0]  ;;  %v335_v49 = vpack.c.bf16 %v326_v45, %v325_v44  ;;  %v1500_v3 = vor.u32 %v1649_v2, %v1499_v0  ;;  %v1493_v5 = vld [vmem:[%s2459_s3 + $0x88] sm:$0xf0]  ;;  %v1427_v6 = vld [vmem:[%s2459_s3] sm:$0xf] }
  0x39   : > { %811 = vmatpush.bf16.msra.mxu3 %v1532_v34  ;;  %v1491_v9 = vld [vmem:[%s2459_s3 + $0x80] sm:$0xf]  ;;  %v1647_v10 = vld [vmem:[%s2459_s3 + $0x84] sm:$0xf0]  ;;  %v327_v11 = vld [vmem:[%s2031_s16 + $0x70] sm:$0xff] }
  0x3a   : > { %v1492_v14 = vor.u32 %v1647_v10, %v1491_v9  ;;  %v345_v16 = vld [vmem:[%s2458_s2] sm:$0x3]  ;;  %v1669_v21 = vld [vmem:[%s2461_s5 + $0x38] sm:$0xff]  ;;  %v1668_v37 = vld [vmem:[%s2461_s5 + $0x30] sm:$0xff] }
  0x3b   : > { %861 = vmatpush.bf16.msrb.mxu0 %v1464_v54  ;;  %v1635_v54 = vld [vmem:[%s2459_s3 + $0x24] sm:$0xf0]  ;;  %v2262_v20 = vperm.slane %v345_v16, 1  ;;  %v1677_v22 = vld [vmem:[%s2461_s5 + $0x78] sm:$0xff] }
  0x3c   : > { %910 = vmatpush.bf16.msrb.mxu1 %v1528_v56  ;;  %763 = vmatpush.bf16.msra.mxu2 %v1460_v42  ;;  %v1444_v55 = vor.u32 %v1635_v54, %v1443_v53  ;;  %v1507_v56 = vld [vmem:[%s2459_s3 + $0xa0] sm:$0xf]  ;;  %v1667_v53 = vld [vmem:[%s2461_s5 + $0x28] sm:$0xff] }
  0x3d   : > { %v1508_v58 = vor.u32 %v1651_v57, %v1507_v56  ;;  %v1675_v54 = vld [vmem:[%s2461_s5 + $0x68] sm:$0xff] }
  0x3e   : > { %1410 = vmatmul.msk.bf16.gmra.mxu0 %vm391_vm0, %v330_v41 }
  0x3f   : > { %1418 = vmatmul.msk.bf16.gmra.mxu1 %vm391_vm0, %v330_v41  ;;  %862 = vmatpush.bf16.msrb.mxu0 %v1456_v63  ;;  %v1655_v41 = vld [vmem:[%s2459_s3 + $0xc4] sm:$0xf0]  ;;  %v1633_v63 = vld [vmem:[%s2459_s3 + $0x14] sm:$0xf0] }
  0x40   : > { %911 = vmatpush.bf16.msrb.mxu1 %v1520_v1  ;;  %v1524_v43 = vor.u32 %v1655_v41, %v1523_v40  ;;  %v1436_v1 = vor.u32 %v1633_v63, %v1435_v62 }
  0x42   : > { %812 = vmatpush.bf16.msra.mxu3 %v1524_v43 }
  0x43   : > { %863 = vmatpush.bf16.msrb.mxu0 %v1448_v8  ;;  %v1631_v8 = vld [vmem:[%s2459_s3 + $0x4] sm:$0xf0] }
  0x44   : > { %912 = vmatpush.bf16.msrb.mxu1 %v1512_v12  ;;  %v328_v12 = vld [vmem:[%s2031_s16 + $0x78] sm:$0xff]  ;;  %v1428_v13 = vor.u32 %v1631_v8, %v1427_v6  ;;  %v1674_v6 = vld [vmem:[%s2461_s5 + $0x60] sm:$0xff]  ;;  %s1281_s16 = sshll.u32 %s1278_s14, 4  ;;  %s1282_s16 = int_to_ptr.hbm [resolvable:$true] %s1281_s16 }
  0x45   : > { %v336_v15 = vpack.c.bf16 %v328_v12, %v327_v11  ;;  %s1850_s17 = sshra.s32 %s1282_s16, 4  ;;  %s1851_s17 = int_to_ptr.hbm [resolvable:$true] %s1850_s17 }
  0x46   : > { %813 = vmatpush.bf16.msra.mxu3 %v1516_v52  ;;  %s1852_s18 = scalar_lea.hbm %s1851_s17, 128  ;;  %p1857_p3 = scmp.lt.s32.totalorder %s1851_s17, %s2463_s7 }
  0x47   : > { %864 = vmatpush.bf16.msrb.mxu0 %v1440_v29  ;;  %p1853_p0 = scmp.ne.s32.totalorder %s1851_s17, %s1852_s18  ;;  %p1858_p4 = scmp.lt.s32.totalorder %s1856_s21, %s1852_s18 }
  0x48   : > { %913 = vmatpush.bf16.msrb.mxu1 %v1504_v38  ;;  %v1676_v38 = vld [vmem:[%s2461_s5 + $0x70] sm:$0xff] }
  0x49   : > { %p1854_p1 = pnand %p1853_p0, %p1992_p5  ;;  %p1859_p7 = por %p1858_p4, %p1857_p3 }
  0x4a   : > { %814 = vmatpush.bf16.msra.mxu3 %v1508_v58 }
  0x4b   : > { %p1855_p2 = pneg %p1854_p1 }
  0x4d   : > { %p1860_p8 = pnand %p1859_p7, %p1855_p2 }
  0x4e   : > { %1411 = vmatmul.msk.bf16.gmra.mxu0 %vm391_vm0, %v331_v50  ;;  %815 = vmatpush.bf16.msra.mxu3 %v1500_v3 }
  0x4f   : > { %1419 = vmatmul.msk.bf16.gmra.mxu1 %vm391_vm0, %v331_v50  ;;  %v1452_v50 = vor.u32 %v1637_v47, %v1451_v46 }
  0x51   : > { %764 = vmatpush.bf16.msra.mxu2 %v1452_v50 }
  0x52   : > { %816 = vmatpush.bf16.msra.mxu3 %v1492_v14 }
  0x55   : > { %765 = vmatpush.bf16.msra.mxu2 %v1444_v55 }
  0x56   : > { %1185 = vmatpush.bf16.msrb.mxu3 %v1677_v22 }
  0x59   : > { %766 = vmatpush.bf16.msra.mxu2 %v1436_v1 }
  0x5a   : > { %1186 = vmatpush.bf16.msrb.mxu3 %v1676_v38 }
  0x5d   : > { %767 = vmatpush.bf16.msra.mxu2 %v1428_v13 }
  0x5e   : > { %1412 = vmatmul.msk.bf16.gmra.mxu0 %vm391_vm0, %v332_v59  ;;  %1187 = vmatpush.bf16.msrb.mxu3 %v1675_v54  ;;  %v1663_v54 = vld [vmem:[%s2461_s5 + $0x8] sm:$0xff] }
  0x5f   : > { %1420 = vmatmul.msk.bf16.gmra.mxu1 %vm391_vm0, %v332_v59  ;;  %v1630_v59 = vld [vmem:[%s2459_s3 + $0x4] sm:$0xf] }
  0x60   : > { %v1432_v61 = vor.u32 %v1630_v59, %v1429_v60 }
  0x61   : > { %1136 = vmatpush.bf16.msrb.mxu2 %v1669_v21 }
  0x62   : > { %865 = vmatpush.bf16.msrb.mxu0 %v1432_v61  ;;  %1188 = vmatpush.bf16.msrb.mxu3 %v1674_v6 }
  0x65   : > { %1137 = vmatpush.bf16.msrb.mxu2 %v1668_v37 }
  0x69   : > { %1138 = vmatpush.bf16.msrb.mxu2 %v1667_v53 }
  0x6e   : > { %1413 = vmatmul.msk.bf16.gmra.mxu0 %vm391_vm0, %v333_v4 }
  0x6f   : > { %1421 = vmatmul.msk.bf16.gmra.mxu1 %vm391_vm0, %v333_v4  ;;  %v1646_v4 = vld [vmem:[%s2459_s3 + $0x84] sm:$0xf] }
  0x70   : > { %v1496_v7 = vor.u32 %v1646_v4, %v1493_v5  ;;  %v1666_v5 = vld [vmem:[%s2461_s5 + $0x20] sm:$0xff] }
  0x71   : > { %1139 = vmatpush.bf16.msrb.mxu2 %v1666_v5 }
  0x72   : > { %914 = vmatpush.bf16.msrb.mxu1 %v1496_v7 }
  0x7e   : > { %1414 = vmatmul.msk.bf16.gmra.mxu0 %vm391_vm0, %v334_v19 }
  0x7f   : > { %1422 = vmatmul.msk.bf16.gmra.mxu1 %vm391_vm0, %v334_v19  ;;  %v2260_v19 = vperm.slane %v345_v16, 0 }
  0x8e   : > { %1415 = vmatmul.msk.bf16.gmra.mxu0 %vm391_vm0, %v335_v49 }
  0x8f   : > { %1423 = vmatmul.msk.bf16.gmra.mxu1 %vm391_vm0, %v335_v49 }
  0x9e   : > { %1416 = vmatmul.msk.bf16.gmra.mxu0 %vm391_vm0, %v336_v15 }
  0x9f   : > { %1424 = vmatmul.msk.bf16.gmra.mxu1 %vm391_vm0, %v336_v15 }
  0xab   : > { %v425_v17 = vpop.f32.mrf.mxu0 }
  0xac   : > { %v474_v18 = vpop.f32.mrf.mxu1  ;;  %v426_v23 = vadd.f32 %v425_v17, %v2260_v19 }
  0xad   : > { %v475_v24 = vadd.f32 %v474_v18, %v2262_v20 }
  0xae   : > { %v514_v29 = vmax.f32 %v426_v23, 0.0  ;;  %v1665_v23 = vld [vmem:[%s2461_s5 + $0x18] sm:$0xff] }
  0xaf   : > { %v515_v31 = vmax.f32 %v475_v24, 0.0  ;;  %v1673_v24 = vld [vmem:[%s2461_s5 + $0x58] sm:$0xff]  ;;  %1140 = vmatpush.bf16.msrb.mxu2 %v1665_v23 }
  0xb0   : > { %1189 = vmatpush.bf16.msrb.mxu3 %v1673_v24 }
  0xb3   : > { %v427_v25 = vpop.f32.mrf.mxu0 }
  0xb4   : > { %v428_v26 = vadd.f32 %v427_v25, %v2260_v19  ;;  %v476_v27 = vpop.f32.mrf.mxu1 }
  0xb5   : > { %v477_v28 = vadd.f32 %v476_v27, %v2262_v20 }
  0xb6   : > { %v516_v30 = vmax.f32 %v428_v26, 0.0 }
  0xb7   : > { %v517_v32 = vmax.f32 %v477_v28, 0.0 }
  0xb8   : > { %v546_v33 = vpack.c.bf16 %v516_v30, %v514_v29 }
  0xb9   : > { %v547_v34 = vpack.c.bf16 %v517_v32, %v515_v31 }
  0xba   : > { %768 = vmatmul.bf16.vlgmr.msra.gmra.mxu2 %v546_v33  ;;  %866 = vmatmul.bf16.vlgmr.msrb.gmra.mxu0 %v546_v33 }
  0xbb   : > { %817 = vmatmul.bf16.vlgmr.msra.gmra.mxu3 %v547_v34  ;;  %915 = vmatmul.bf16.vlgmr.msrb.gmra.mxu1 %v547_v34  ;;  %v430_v35 = vpop.f32.mrf.mxu0 }
  0xbc   : > { %v479_v36 = vpop.f32.mrf.mxu1  ;;  %v431_v39 = vadd.f32 %v430_v35, %v2260_v19 }
  0xbd   : > { %v480_v40 = vadd.f32 %v479_v36, %v2262_v20 }
  0xbe   : > { %v518_v45 = vmax.f32 %v431_v39, 0.0  ;;  %v1664_v39 = vld [vmem:[%s2461_s5 + $0x10] sm:$0xff] }
  0xbf   : > { %v519_v47 = vmax.f32 %v480_v40, 0.0  ;;  %v1672_v40 = vld [vmem:[%s2461_s5 + $0x50] sm:$0xff]  ;;  %1141 = vmatpush.bf16.msrb.mxu2 %v1664_v39 }
  0xc0   : > { %1190 = vmatpush.bf16.msrb.mxu3 %v1672_v40 }
  0xc3   : > { %v432_v41 = vpop.f32.mrf.mxu0  ;;  %1142 = vmatpush.bf16.msrb.mxu2 %v1663_v54 }
  0xc4   : > { %v433_v42 = vadd.f32 %v432_v41, %v2260_v19  ;;  %v481_v43 = vpop.f32.mrf.mxu1 }
  0xc5   : > { %v482_v44 = vadd.f32 %v481_v43, %v2262_v20 }
  0xc6   : > { %v520_v46 = vmax.f32 %v433_v42, 0.0 }
  0xc7   : > { %v521_v48 = vmax.f32 %v482_v44, 0.0 }
  0xc8   : > { %v548_v49 = vpack.c.bf16 %v520_v46, %v518_v45 }
  0xc9   : > { %v549_v50 = vpack.c.bf16 %v521_v48, %v519_v47 }
  0xca   : > { %773 = vmatmul.bf16.gmra.mxu2 %v548_v49  ;;  %871 = vmatmul.bf16.gmra.mxu0 %v548_v49 }
  0xcb   : > { %822 = vmatmul.bf16.gmra.mxu3 %v549_v50  ;;  %920 = vmatmul.bf16.gmra.mxu1 %v549_v50  ;;  %v435_v51 = vpop.f32.mrf.mxu0 }
  0xcc   : > { %v484_v52 = vpop.f32.mrf.mxu1  ;;  %v436_v55 = vadd.f32 %v435_v51, %v2260_v19 }
  0xcd   : > { %v485_v56 = vadd.f32 %v484_v52, %v2262_v20 }
  0xce   : > { %v522_v61 = vmax.f32 %v436_v55, 0.0  ;;  %v1671_v55 = vld [vmem:[%s2461_s5 + $0x48] sm:$0xff] }
  0xcf   : > { %v523_v63 = vmax.f32 %v485_v56, 0.0  ;;  %1191 = vmatpush.bf16.msrb.mxu3 %v1671_v55 }
  0xd3   : > { %v437_v57 = vpop.f32.mrf.mxu0 }
  0xd4   : > { %v438_v58 = vadd.f32 %v437_v57, %v2260_v19  ;;  %v486_v59 = vpop.f32.mrf.mxu1 }
  0xd5   : > { %v487_v60 = vadd.f32 %v486_v59, %v2262_v20 }
  0xd6   : > { %v524_v62 = vmax.f32 %v438_v58, 0.0 }
  0xd7   : > { %v525_v0 = vmax.f32 %v487_v60, 0.0 }
  0xd8   : > { %v550_v1 = vpack.c.bf16 %v524_v62, %v522_v61 }
  0xd9   : > { %v551_v2 = vpack.c.bf16 %v525_v0, %v523_v63 }
  0xda   : > { %778 = vmatmul.bf16.gmra.mxu2 %v550_v1  ;;  %876 = vmatmul.bf16.gmra.mxu0 %v550_v1 }
  0xdb   : > { %827 = vmatmul.bf16.gmra.mxu3 %v551_v2  ;;  %925 = vmatmul.bf16.gmra.mxu1 %v551_v2  ;;  %v440_v3 = vpop.f32.mrf.mxu0 }
  0xdc   : > { %v489_v4 = vpop.f32.mrf.mxu1  ;;  %v441_v7 = vadd.f32 %v440_v3, %v2260_v19 }
  0xdd   : > { %v490_v8 = vadd.f32 %v489_v4, %v2262_v20 }
  0xde   : > { %v526_v13 = vmax.f32 %v441_v7, 0.0 }
  0xdf   : > { %v527_v15 = vmax.f32 %v490_v8, 0.0  ;;  %v1662_v8 = vld [vmem:[%s2461_s5] sm:$0xff] }
  0xe0   : > { %1143 = vmatpush.bf16.msrb.mxu2 %v1662_v8 }
  0xe3   : > { %v442_v9 = vpop.f32.mrf.mxu0 }
  0xe4   : > { %v443_v10 = vadd.f32 %v442_v9, %v2260_v19  ;;  %v491_v11 = vpop.f32.mrf.mxu1 }
  0xe5   : > { %v492_v12 = vadd.f32 %v491_v11, %v2262_v20 }
  0xe6   : > { %v528_v14 = vmax.f32 %v443_v10, 0.0 }
  0xe7   : > { %v529_v16 = vmax.f32 %v492_v12, 0.0 }
  0xe8   : > { %v552_v17 = vpack.c.bf16 %v528_v14, %v526_v13  ;;  %v1670_v13 = vld [vmem:[%s2461_s5 + $0x40] sm:$0xff] }
  0xe9   : > { %v553_v18 = vpack.c.bf16 %v529_v16, %v527_v15  ;;  %1192 = vmatpush.bf16.msrb.mxu3 %v1670_v13 }
  0xea   : > { %783 = vmatmul.bf16.gmra.mxu2 %v552_v17  ;;  %881 = vmatmul.bf16.gmra.mxu0 %v552_v17 }
  0xeb   : > { %832 = vmatmul.bf16.gmra.mxu3 %v553_v18  ;;  %930 = vmatmul.bf16.gmra.mxu1 %v553_v18  ;;  %v445_v21 = vpop.f32.mrf.mxu0 }
  0xec   : > { %v494_v22 = vpop.f32.mrf.mxu1  ;;  %v446_v25 = vadd.f32 %v445_v21, %v2260_v19 }
  0xed   : > { %v495_v26 = vadd.f32 %v494_v22, %v2262_v20 }
  0xee   : > { %v530_v31 = vmax.f32 %v446_v25, 0.0 }
  0xef   : > { %v531_v33 = vmax.f32 %v495_v26, 0.0 }
  0xf3   : > { %v447_v27 = vpop.f32.mrf.mxu0 }
  0xf4   : > { %v448_v28 = vadd.f32 %v447_v27, %v2260_v19  ;;  %v496_v29 = vpop.f32.mrf.mxu1 }
  0xf5   : > { %v497_v30 = vadd.f32 %v496_v29, %v2262_v20 }
  0xf6   : > { %v532_v32 = vmax.f32 %v448_v28, 0.0 }
  0xf7   : > { %v533_v34 = vmax.f32 %v497_v30, 0.0 }
  0xf8   : > { %v554_v35 = vpack.c.bf16 %v532_v32, %v530_v31 }
  0xf9   : > { %v555_v36 = vpack.c.bf16 %v533_v34, %v531_v33 }
  0xfa   : > { %788 = vmatmul.bf16.gmra.mxu2 %v554_v35  ;;  %886 = vmatmul.bf16.gmra.mxu0 %v554_v35 }
  0xfb   : > { %837 = vmatmul.bf16.gmra.mxu3 %v555_v36  ;;  %935 = vmatmul.bf16.gmra.mxu1 %v555_v36  ;;  %v450_v37 = vpop.f32.mrf.mxu0 }
  0xfc   : > { %v499_v38 = vpop.f32.mrf.mxu1  ;;  %v451_v41 = vadd.f32 %v450_v37, %v2260_v19 }
  0xfd   : > { %v500_v42 = vadd.f32 %v499_v38, %v2262_v20 }
  0xfe   : > { %v534_v47 = vmax.f32 %v451_v41, 0.0 }
  0xff   : > { %v535_v49 = vmax.f32 %v500_v42, 0.0 }
 0x103   : > { %v452_v43 = vpop.f32.mrf.mxu0 }
 0x104   : > { %v453_v44 = vadd.f32 %v452_v43, %v2260_v19  ;;  %v501_v45 = vpop.f32.mrf.mxu1 }
 0x105   : > { %v502_v46 = vadd.f32 %v501_v45, %v2262_v20 }
 0x106   : > { %v536_v48 = vmax.f32 %v453_v44, 0.0 }
 0x107   : > { %v537_v50 = vmax.f32 %v502_v46, 0.0 }
 0x108   : > { %v556_v51 = vpack.c.bf16 %v536_v48, %v534_v47 }
 0x109   : > { %v557_v52 = vpack.c.bf16 %v537_v50, %v535_v49 }
 0x10a   : > { %793 = vmatmul.bf16.gmra.mxu2 %v556_v51  ;;  %891 = vmatmul.bf16.gmra.mxu0 %v556_v51 }
 0x10b   : > { %842 = vmatmul.bf16.gmra.mxu3 %v557_v52  ;;  %940 = vmatmul.bf16.gmra.mxu1 %v557_v52  ;;  %v455_v53 = vpop.f32.mrf.mxu0 }
 0x10c   : > { %v504_v56 = vpop.f32.mrf.mxu1  ;;  %v456_v57 = vadd.f32 %v455_v53, %v2260_v19 }
 0x10d   : > { %v505_v58 = vadd.f32 %v504_v56, %v2262_v20 }
 0x10e   : > { %v538_v63 = vmax.f32 %v456_v57, 0.0 }
 0x10f   : > { %v539_v1 = vmax.f32 %v505_v58, 0.0 }
 0x113   : > { %v457_v59 = vpop.f32.mrf.mxu0 }
 0x114   : > { %v458_v60 = vadd.f32 %v457_v59, %v2260_v19  ;;  %v506_v61 = vpop.f32.mrf.mxu1 }
 0x115   : > { %v507_v62 = vadd.f32 %v506_v61, %v2262_v20 }
 0x116   : > { %v540_v0 = vmax.f32 %v458_v60, 0.0 }
 0x117   : > { %v541_v2 = vmax.f32 %v507_v62, 0.0 }
 0x118   : > { %v558_v3 = vpack.c.bf16 %v540_v0, %v538_v63 }
 0x119   : > { %v559_v4 = vpack.c.bf16 %v541_v2, %v539_v1 }
 0x11a   : > { %798 = vmatmul.bf16.gmra.mxu2 %v558_v3  ;;  %896 = vmatmul.bf16.gmra.mxu0 %v558_v3 }
 0x11b   : > { %847 = vmatmul.bf16.gmra.mxu3 %v559_v4  ;;  %945 = vmatmul.bf16.gmra.mxu1 %v559_v4  ;;  %v460_v5 = vpop.f32.mrf.mxu0 }
 0x11c   : > { %v509_v6 = vpop.f32.mrf.mxu1  ;;  %v461_v7 = vadd.f32 %v460_v5, %v2260_v19 }
 0x11d   : > { %v510_v9 = vadd.f32 %v509_v6, %v2262_v20 }
 0x11e   : > { %v542_v15 = vmax.f32 %v461_v7, 0.0 }
 0x11f   : > { %v543_v17 = vmax.f32 %v510_v9, 0.0 }
 0x123   : > { %v462_v10 = vpop.f32.mrf.mxu0 }
 0x124   : > { %v463_v11 = vadd.f32 %v462_v10, %v2260_v19  ;;  %v511_v12 = vpop.f32.mrf.mxu1  ;;  %v594_v19 = vld [vmem:[#allocation5] sm:$0x3] }
 0x125   : > { %v512_v14 = vadd.f32 %v511_v12, %v2262_v20  ;;  %v2344_v24 = vperm.slane %v594_v19, 1  ;;  %v2347_v20 = vperm.slane %v594_v19, 0 }
 0x126   : > { %v544_v16 = vmax.f32 %v463_v11, 0.0 }
 0x127   : > { %v545_v18 = vmax.f32 %v512_v14, 0.0 }
 0x128   : > { %v560_v21 = vpack.c.bf16 %v544_v16, %v542_v15 }
 0x129   : > { %v561_v22 = vpack.c.bf16 %v545_v18, %v543_v17 }
 0x12a   : > { %803 = vmatmul.bf16.gmra.mxu2 %v560_v21  ;;  %901 = vmatmul.bf16.gmra.mxu0 %v560_v21 }
 0x12b   : > { %852 = vmatmul.bf16.gmra.mxu3 %v561_v22  ;;  %950 = vmatmul.bf16.gmra.mxu1 %v561_v22 }
 0x137   : > { %v867_v23 = vpop.f32.mrf.mxu0 }
 0x138   : > { %v916_v25 = vpop.f32.mrf.mxu1  ;;  %v868_v26 = vadd.f32 %v867_v23, %v2344_v24 }
 0x13a   : > { %v917_v30 = vadd.f32 %v916_v25, %v868_v26 }
 0x13c   : > { %v957_v35 = vmax.f32 %v917_v30, 0.0 }
 0x13d   : > { %v769_v27 = vpop.f32.mrf.mxu2 }
 0x13e   : > { %v818_v28 = vpop.f32.mrf.mxu3  ;;  %v770_v33 = vadd.f32 %v769_v27, %v2347_v20 }
 0x13f   : > { %v869_v29 = vpop.f32.mrf.mxu0 }
 0x140   : > { %v870_v31 = vadd.f32 %v869_v29, %v2344_v24  ;;  %v918_v32 = vpop.f32.mrf.mxu1  ;;  %v819_v38 = vadd.f32 %v818_v28, %v770_v33 }
 0x142   : > { %v919_v34 = vadd.f32 %v918_v32, %v870_v31  ;;  %v956_v45 = vmax.f32 %v819_v38, 0.0 }
 0x144   : > { %v959_v36 = vmax.f32 %v919_v34, 0.0 }
 0x145   : > { %v771_v37 = vpop.f32.mrf.mxu2 }
 0x146   : > { %v989_v39 = vpack.c.bf16 %v959_v36, %v957_v35  ;;  %v772_v40 = vadd.f32 %v771_v37, %v2347_v20  ;;  %v820_v41 = vpop.f32.mrf.mxu3 }
 0x147   : > { %v872_v42 = vpop.f32.mrf.mxu0 }
 0x148   : > { %v821_v43 = vadd.f32 %v820_v41, %v772_v40  ;;  %v921_v44 = vpop.f32.mrf.mxu1  ;;  %1193 = vmatmul.bf16.vlgmr.msrb.gmra.mxu3 %v989_v39  ;;  %v873_v47 = vadd.f32 %v872_v42, %v2344_v24 }
 0x14a   : > { %v958_v46 = vmax.f32 %v821_v43, 0.0  ;;  %v922_v52 = vadd.f32 %v921_v44, %v873_v47 }
 0x14c   : > { %v988_v48 = vpack.c.bf16 %v958_v46, %v956_v45  ;;  %v961_v57 = vmax.f32 %v922_v52, 0.0 }
 0x14d   : > { %v774_v49 = vpop.f32.mrf.mxu2 }
 0x14e   : > { %v823_v50 = vpop.f32.mrf.mxu3  ;;  %1144 = vmatmul.bf16.vlgmr.msrb.gmra.mxu2 %v988_v48  ;;  %v775_v55 = vadd.f32 %v774_v49, %v2347_v20 }
 0x14f   : > { %v874_v51 = vpop.f32.mrf.mxu0 }
 0x150   : > { %v875_v53 = vadd.f32 %v874_v51, %v2344_v24  ;;  %v923_v54 = vpop.f32.mrf.mxu1  ;;  %v824_v60 = vadd.f32 %v823_v50, %v775_v55 }
 0x152   : > { %v924_v56 = vadd.f32 %v923_v54, %v875_v53  ;;  %v960_v3 = vmax.f32 %v824_v60, 0.0 }
 0x154   : > { %v963_v58 = vmax.f32 %v924_v56, 0.0 }
 0x155   : > { %v776_v59 = vpop.f32.mrf.mxu2 }
 0x156   : > { %v777_v61 = vadd.f32 %v776_v59, %v2347_v20  ;;  %v825_v62 = vpop.f32.mrf.mxu3  ;;  %v991_v63 = vpack.c.bf16 %v963_v58, %v961_v57 }
 0x157   : > { %v877_v0 = vpop.f32.mrf.mxu0 }
 0x158   : > { %v826_v1 = vadd.f32 %v825_v62, %v777_v61  ;;  %v926_v2 = vpop.f32.mrf.mxu1  ;;  %1198 = vmatmul.bf16.gmra.mxu3 %v991_v63  ;;  %v878_v5 = vadd.f32 %v877_v0, %v2344_v24 }
 0x15a   : > { %v962_v4 = vmax.f32 %v826_v1, 0.0  ;;  %v927_v10 = vadd.f32 %v926_v2, %v878_v5 }
 0x15c   : > { %v990_v6 = vpack.c.bf16 %v962_v4, %v960_v3  ;;  %v965_v15 = vmax.f32 %v927_v10, 0.0 }
 0x15d   : > { %v779_v7 = vpop.f32.mrf.mxu2 }
 0x15e   : > { %v828_v8 = vpop.f32.mrf.mxu3  ;;  %1149 = vmatmul.bf16.gmra.mxu2 %v990_v6  ;;  %v780_v13 = vadd.f32 %v779_v7, %v2347_v20 }
 0x15f   : > { %v879_v9 = vpop.f32.mrf.mxu0 }
 0x160   : > { %v880_v11 = vadd.f32 %v879_v9, %v2344_v24  ;;  %v928_v12 = vpop.f32.mrf.mxu1  ;;  %v829_v18 = vadd.f32 %v828_v8, %v780_v13 }
 0x162   : > { %v929_v14 = vadd.f32 %v928_v12, %v880_v11  ;;  %v964_v27 = vmax.f32 %v829_v18, 0.0 }
 0x164   : > { %v967_v16 = vmax.f32 %v929_v14, 0.0 }
 0x165   : > { %v781_v17 = vpop.f32.mrf.mxu2 }
 0x166   : > { %v782_v21 = vadd.f32 %v781_v17, %v2347_v20  ;;  %v830_v22 = vpop.f32.mrf.mxu3  ;;  %v993_v19 = vpack.c.bf16 %v967_v16, %v965_v15 }
 0x167   : > { %v882_v23 = vpop.f32.mrf.mxu0 }
 0x168   : > { %v831_v25 = vadd.f32 %v830_v22, %v782_v21  ;;  %v931_v26 = vpop.f32.mrf.mxu1  ;;  %1203 = vmatmul.bf16.gmra.mxu3 %v993_v19  ;;  %v883_v29 = vadd.f32 %v882_v23, %v2344_v24 }
 0x16a   : > { %v966_v28 = vmax.f32 %v831_v25, 0.0  ;;  %v932_v34 = vadd.f32 %v931_v26, %v883_v29 }
 0x16c   : > { %v992_v30 = vpack.c.bf16 %v966_v28, %v964_v27  ;;  %v969_v39 = vmax.f32 %v932_v34, 0.0 }
 0x16d   : > { %v784_v31 = vpop.f32.mrf.mxu2 }
 0x16e   : > { %v833_v32 = vpop.f32.mrf.mxu3  ;;  %1154 = vmatmul.bf16.gmra.mxu2 %v992_v30  ;;  %v785_v37 = vadd.f32 %v784_v31, %v2347_v20 }
 0x16f   : > { %v884_v33 = vpop.f32.mrf.mxu0 }
 0x170   : > { %v885_v35 = vadd.f32 %v884_v33, %v2344_v24  ;;  %v933_v36 = vpop.f32.mrf.mxu1  ;;  %v834_v42 = vadd.f32 %v833_v32, %v785_v37 }
 0x172   : > { %v934_v38 = vadd.f32 %v933_v36, %v885_v35  ;;  %v968_v49 = vmax.f32 %v834_v42, 0.0 }
 0x174   : > { %v971_v40 = vmax.f32 %v934_v38, 0.0 }
 0x175   : > { %v786_v41 = vpop.f32.mrf.mxu2 }
 0x176   : > { %v787_v43 = vadd.f32 %v786_v41, %v2347_v20  ;;  %v835_v44 = vpop.f32.mrf.mxu3  ;;  %v995_v45 = vpack.c.bf16 %v971_v40, %v969_v39 }
 0x177   : > { %v887_v46 = vpop.f32.mrf.mxu0 }
 0x178   : > { %v836_v47 = vadd.f32 %v835_v44, %v787_v43  ;;  %v936_v48 = vpop.f32.mrf.mxu1  ;;  %1208 = vmatmul.bf16.gmra.mxu3 %v995_v45  ;;  %v888_v51 = vadd.f32 %v887_v46, %v2344_v24 }
 0x17a   : > { %v970_v50 = vmax.f32 %v836_v47, 0.0  ;;  %v937_v56 = vadd.f32 %v936_v48, %v888_v51 }
 0x17c   : > { %v994_v52 = vpack.c.bf16 %v970_v50, %v968_v49  ;;  %v973_v61 = vmax.f32 %v937_v56, 0.0 }
 0x17d   : > { %v789_v53 = vpop.f32.mrf.mxu2 }
 0x17e   : > { %v838_v54 = vpop.f32.mrf.mxu3  ;;  %1159 = vmatmul.bf16.gmra.mxu2 %v994_v52  ;;  %v790_v59 = vadd.f32 %v789_v53, %v2347_v20 }
 0x17f   : > { %v889_v55 = vpop.f32.mrf.mxu0 }
 0x180   : > { %v890_v57 = vadd.f32 %v889_v55, %v2344_v24  ;;  %v938_v58 = vpop.f32.mrf.mxu1  ;;  %v839_v0 = vadd.f32 %v838_v54, %v790_v59 }
 0x182   : > { %v939_v60 = vadd.f32 %v938_v58, %v890_v57  ;;  %v972_v7 = vmax.f32 %v839_v0, 0.0 }
 0x184   : > { %v975_v62 = vmax.f32 %v939_v60, 0.0 }
 0x185   : > { %v791_v63 = vpop.f32.mrf.mxu2 }
 0x186   : > { %v997_v1 = vpack.c.bf16 %v975_v62, %v973_v61  ;;  %v792_v2 = vadd.f32 %v791_v63, %v2347_v20  ;;  %v840_v3 = vpop.f32.mrf.mxu3 }
 0x187   : > { %v892_v4 = vpop.f32.mrf.mxu0 }
 0x188   : > { %v841_v5 = vadd.f32 %v840_v3, %v792_v2  ;;  %v941_v6 = vpop.f32.mrf.mxu1  ;;  %1213 = vmatmul.bf16.gmra.mxu3 %v997_v1  ;;  %v893_v10 = vadd.f32 %v892_v4, %v2344_v24 }
 0x18a   : > { %v974_v8 = vmax.f32 %v841_v5, 0.0  ;;  %v942_v14 = vadd.f32 %v941_v6, %v893_v10 }
 0x18c   : > { %v996_v9 = vpack.c.bf16 %v974_v8, %v972_v7  ;;  %v977_v21 = vmax.f32 %v942_v14, 0.0 }
 0x18d   : > { %v794_v11 = vpop.f32.mrf.mxu2 }
 0x18e   : > { %v843_v12 = vpop.f32.mrf.mxu3  ;;  %1164 = vmatmul.bf16.gmra.mxu2 %v996_v9  ;;  %v795_v17 = vadd.f32 %v794_v11, %v2347_v20 }
 0x18f   : > { %v894_v13 = vpop.f32.mrf.mxu0 }
 0x190   : > { %v895_v15 = vadd.f32 %v894_v13, %v2344_v24  ;;  %v943_v16 = vpop.f32.mrf.mxu1  ;;  %v844_v23 = vadd.f32 %v843_v12, %v795_v17  ;;  %v2383_v12 = vld [vmem:[%s2462_s6] ss:$0 sm:$0xff] }
 0x192   : > { %v944_v18 = vadd.f32 %v943_v16, %v895_v15  ;;  %v976_v31 = vmax.f32 %v844_v23, 0.0 }
 0x194   : > { %v979_v22 = vmax.f32 %v944_v18, 0.0 }
 0x195   : > { %v796_v19 = vpop.f32.mrf.mxu2 }
 0x196   : > { %v999_v25 = vpack.c.bf16 %v979_v22, %v977_v21  ;;  %v797_v26 = vadd.f32 %v796_v19, %v2347_v20  ;;  %v845_v27 = vpop.f32.mrf.mxu3 }
 0x197   : > { %v897_v28 = vpop.f32.mrf.mxu0 }
 0x198   : > { %v846_v29 = vadd.f32 %v845_v27, %v797_v26  ;;  %v946_v30 = vpop.f32.mrf.mxu1  ;;  %1218 = vmatmul.bf16.gmra.mxu3 %v999_v25  ;;  %v898_v34 = vadd.f32 %v897_v28, %v2344_v24 }
 0x19a   : > { %v978_v32 = vmax.f32 %v846_v29, 0.0  ;;  %v947_v38 = vadd.f32 %v946_v30, %v898_v34 }
 0x19c   : > { %v998_v33 = vpack.c.bf16 %v978_v32, %v976_v31  ;;  %v981_v43 = vmax.f32 %v947_v38, 0.0 }
 0x19d   : > { %v799_v35 = vpop.f32.mrf.mxu2 }
 0x19e   : > { %v848_v36 = vpop.f32.mrf.mxu3  ;;  %1169 = vmatmul.bf16.gmra.mxu2 %v998_v33  ;;  %v800_v41 = vadd.f32 %v799_v35, %v2347_v20 }
 0x19f   : > { %v899_v37 = vpop.f32.mrf.mxu0 }
 0x1a0   : > { %v900_v39 = vadd.f32 %v899_v37, %v2344_v24  ;;  %v948_v40 = vpop.f32.mrf.mxu1  ;;  %v849_v46 = vadd.f32 %v848_v36, %v800_v41 }
 0x1a2   : > { %v949_v42 = vadd.f32 %v948_v40, %v900_v39  ;;  %v980_v53 = vmax.f32 %v849_v46, 0.0 }
 0x1a4   : > { %v983_v44 = vmax.f32 %v949_v42, 0.0 }
 0x1a5   : > { %v801_v45 = vpop.f32.mrf.mxu2 }
 0x1a6   : > { %v1001_v47 = vpack.c.bf16 %v983_v44, %v981_v43  ;;  %v802_v48 = vadd.f32 %v801_v45, %v2347_v20  ;;  %v850_v49 = vpop.f32.mrf.mxu3 }
 0x1a7   : > { %v902_v50 = vpop.f32.mrf.mxu0 }
 0x1a8   : > { %v851_v51 = vadd.f32 %v850_v49, %v802_v48  ;;  %v951_v52 = vpop.f32.mrf.mxu1  ;;  %1223 = vmatmul.bf16.gmra.mxu3 %v1001_v47  ;;  %v903_v56 = vadd.f32 %v902_v50, %v2344_v24 }
 0x1aa   : > { %v982_v54 = vmax.f32 %v851_v51, 0.0  ;;  %v952_v60 = vadd.f32 %v951_v52, %v903_v56 }
 0x1ac   : > { %v1000_v55 = vpack.c.bf16 %v982_v54, %v980_v53  ;;  %v985_v1 = vmax.f32 %v952_v60, 0.0 }
 0x1ad   : > { %v804_v57 = vpop.f32.mrf.mxu2 }
 0x1ae   : > { %v853_v58 = vpop.f32.mrf.mxu3  ;;  %1174 = vmatmul.bf16.gmra.mxu2 %v1000_v55  ;;  %v805_v63 = vadd.f32 %v804_v57, %v2347_v20 }
 0x1af   : > { %v904_v59 = vpop.f32.mrf.mxu0 }
 0x1b0   : > { %v905_v61 = vadd.f32 %v904_v59, %v2344_v24  ;;  %v953_v62 = vpop.f32.mrf.mxu1  ;;  %v854_v4 = vadd.f32 %v853_v58, %v805_v63 }
 0x1b2   : > { %v954_v0 = vadd.f32 %v953_v62, %v905_v61  ;;  %v984_v9 = vmax.f32 %v854_v4, 0.0 }
 0x1b4   : > { %v987_v2 = vmax.f32 %v954_v0, 0.0 }
 0x1b5   : > { %v806_v3 = vpop.f32.mrf.mxu2 }
 0x1b6   : > { %v1003_v5 = vpack.c.bf16 %v987_v2, %v985_v1  ;;  %v807_v6 = vadd.f32 %v806_v3, %v2347_v20  ;;  %v855_v7 = vpop.f32.mrf.mxu3 }
 0x1b8   : > { %v856_v8 = vadd.f32 %v855_v7, %v807_v6  ;;  %1228 = vmatmul.bf16.gmra.mxu3 %v1003_v5 }
 0x1ba   : > { %v986_v10 = vmax.f32 %v856_v8, 0.0 }
 0x1bc   : > { %v1002_v11 = vpack.c.bf16 %v986_v10, %v984_v9 }
 0x1be   : > { %1179 = vmatmul.bf16.gmra.mxu2 %v1002_v11 }
 0x1cb   : > { %v1194_v24 = vpop.f32.mrf.mxu3 }
 0x1d1   : > { %v1145_v13 = vpop.f32.mrf.mxu2 }
 0x1d2   : > { %v1146_v14 = vadd.f32 %v2383_v12, %v1145_v13 }
 0x1d3   : > { %v1196_v15 = vpop.f32.mrf.mxu3 }
 0x1d4   : > { %v1195_v20 = vadd.f32 %v1194_v24, %v1146_v14 }
 0x1d6   : > { %1744 = vtanh.f32 %v1195_v20 }
 0x1d9   : > { %v1147_v16 = vpop.f32.mrf.mxu2 }
 0x1da   : > { %v1148_v17 = vadd.f32 %v2383_v12, %v1147_v16 }
 0x1db   : > { %v1199_v18 = vpop.f32.mrf.mxu3 }
 0x1dc   : > { %v1745_v21 = vpop.eup %1744  ;;  %v1197_v22 = vadd.f32 %v1196_v15, %v1148_v17 }
 0x1dd   : > { %1250 = vst [vmem:[%s2390_s29] sm:$0xff] %v1745_v21 }
 0x1de   : > { %1746 = vtanh.f32 %v1197_v22 }
 0x1e1   : > { %v1150_v19 = vpop.f32.mrf.mxu2 }
 0x1e2   : > { %v1151_v23 = vadd.f32 %v2383_v12, %v1150_v19 }
 0x1e3   : > { %v1201_v25 = vpop.f32.mrf.mxu3 }
 0x1e4   : > { %v1747_v26 = vpop.eup %1746  ;;  %v1200_v27 = vadd.f32 %v1199_v18, %v1151_v23 }
 0x1e5   : > { %1251 = vst [vmem:[%s2390_s29 + $0x8] sm:$0xff] %v1747_v26 }
 0x1e6   : > { %1748 = vtanh.f32 %v1200_v27 }
 0x1e9   : > { %v1152_v28 = vpop.f32.mrf.mxu2 }
 0x1ea   : > { %v1153_v29 = vadd.f32 %v2383_v12, %v1152_v28 }
 0x1eb   : > { %v1204_v30 = vpop.f32.mrf.mxu3 }
 0x1ec   : > { %v1749_v31 = vpop.eup %1748  ;;  %v1202_v32 = vadd.f32 %v1201_v25, %v1153_v29 }
 0x1ed   : > { %1252 = vst [vmem:[%s2390_s29 + $0x10] sm:$0xff] %v1749_v31 }
 0x1ee   : > { %1750 = vtanh.f32 %v1202_v32 }
 0x1f1   : > { %v1155_v33 = vpop.f32.mrf.mxu2 }
 0x1f2   : > { %v1156_v34 = vadd.f32 %v2383_v12, %v1155_v33 }
 0x1f3   : > { %v1206_v35 = vpop.f32.mrf.mxu3 }
 0x1f4   : > { %v1751_v36 = vpop.eup %1750  ;;  %v1205_v37 = vadd.f32 %v1204_v30, %v1156_v34 }
 0x1f5   : > { %1253 = vst [vmem:[%s2390_s29 + $0x18] sm:$0xff] %v1751_v36 }
 0x1f6   : > { %1752 = vtanh.f32 %v1205_v37 }
 0x1f9   : > { %v1157_v38 = vpop.f32.mrf.mxu2 }
 0x1fa   : > { %v1158_v39 = vadd.f32 %v2383_v12, %v1157_v38 }
 0x1fb   : > { %v1209_v40 = vpop.f32.mrf.mxu3 }
 0x1fc   : > { %v1753_v41 = vpop.eup %1752  ;;  %v1207_v42 = vadd.f32 %v1206_v35, %v1158_v39 }
 0x1fd   : > { %1254 = vst [vmem:[%s2390_s29 + $0x20] sm:$0xff] %v1753_v41 }
 0x1fe   : > { %1754 = vtanh.f32 %v1207_v42 }
 0x201   : > { %v1160_v43 = vpop.f32.mrf.mxu2 }
 0x202   : > { %v1161_v44 = vadd.f32 %v2383_v12, %v1160_v43 }
 0x203   : > { %v1211_v45 = vpop.f32.mrf.mxu3 }
 0x204   : > { %v1755_v46 = vpop.eup %1754  ;;  %v1210_v47 = vadd.f32 %v1209_v40, %v1161_v44 }
 0x205   : > { %1255 = vst [vmem:[%s2390_s29 + $0x28] sm:$0xff] %v1755_v46 }
 0x206   : > { %1756 = vtanh.f32 %v1210_v47 }
 0x209   : > { %v1162_v48 = vpop.f32.mrf.mxu2 }
 0x20a   : > { %v1163_v49 = vadd.f32 %v2383_v12, %v1162_v48 }
 0x20b   : > { %v1214_v50 = vpop.f32.mrf.mxu3 }
 0x20c   : > { %v1757_v51 = vpop.eup %1756  ;;  %v1212_v52 = vadd.f32 %v1211_v45, %v1163_v49 }
 0x20d   : > { %1256 = vst [vmem:[%s2390_s29 + $0x30] sm:$0xff] %v1757_v51 }
 0x20e   : > { %1758 = vtanh.f32 %v1212_v52 }
 0x211   : > { %v1165_v53 = vpop.f32.mrf.mxu2 }
 0x212   : > { %v1166_v54 = vadd.f32 %v2383_v12, %v1165_v53 }
 0x213   : > { %v1216_v55 = vpop.f32.mrf.mxu3 }
 0x214   : > { %v1759_v56 = vpop.eup %1758  ;;  %v1215_v57 = vadd.f32 %v1214_v50, %v1166_v54 }
 0x215   : > { %1257 = vst [vmem:[%s2390_s29 + $0x38] sm:$0xff] %v1759_v56 }
 0x216   : > { %1760 = vtanh.f32 %v1215_v57 }
 0x219   : > { %v1167_v58 = vpop.f32.mrf.mxu2 }
 0x21a   : > { %v1168_v59 = vadd.f32 %v2383_v12, %v1167_v58 }
 0x21b   : > { %v1219_v60 = vpop.f32.mrf.mxu3 }
 0x21c   : > { %v1761_v61 = vpop.eup %1760  ;;  %v1217_v62 = vadd.f32 %v1216_v55, %v1168_v59 }
 0x21d   : > { %1258 = vst [vmem:[%s2390_s29 + $0x40] sm:$0xff] %v1761_v61 }
 0x21e   : > { %1762 = vtanh.f32 %v1217_v62 }
 0x221   : > { %v1170_v63 = vpop.f32.mrf.mxu2 }
 0x222   : > { %v1171_v0 = vadd.f32 %v2383_v12, %v1170_v63 }
 0x223   : > { %v1221_v1 = vpop.f32.mrf.mxu3 }
 0x224   : > { %v1763_v2 = vpop.eup %1762  ;;  %v1220_v3 = vadd.f32 %v1219_v60, %v1171_v0 }
 0x225   : > { %1259 = vst [vmem:[%s2390_s29 + $0x48] sm:$0xff] %v1763_v2 }
 0x226   : > { %1764 = vtanh.f32 %v1220_v3 }
 0x229   : > { %v1172_v4 = vpop.f32.mrf.mxu2 }
 0x22a   : > { %v1173_v5 = vadd.f32 %v2383_v12, %v1172_v4 }
 0x22b   : > { %v1224_v8 = vpop.f32.mrf.mxu3 }
 0x22c   : > { %v1765_v6 = vpop.eup %1764  ;;  %v1222_v7 = vadd.f32 %v1221_v1, %v1173_v5 }
 0x22d   : > { %1260 = vst [vmem:[%s2390_s29 + $0x50] sm:$0xff] %v1765_v6 }
 0x22e   : > { %1766 = vtanh.f32 %v1222_v7 }
 0x231   : > { %v1175_v9 = vpop.f32.mrf.mxu2 }
 0x232   : > { %v1176_v10 = vadd.f32 %v2383_v12, %v1175_v9 }
 0x233   : > { %v1226_v13 = vpop.f32.mrf.mxu3 }
 0x234   : > { %v1767_v11 = vpop.eup %1766  ;;  %v1225_v24 = vadd.f32 %v1224_v8, %v1176_v10 }
 0x235   : > { %1261 = vst [vmem:[%s2390_s29 + $0x58] sm:$0xff] %v1767_v11 }
 0x236   : > { %1768 = vtanh.f32 %v1225_v24 }
 0x239   : > { %v1177_v14 = vpop.f32.mrf.mxu2 }
 0x23a   : > { %v1178_v15 = vadd.f32 %v2383_v12, %v1177_v14 }
 0x23b   : > { %v1229_v17 = vpop.f32.mrf.mxu3 }
 0x23c   : > { %v1769_v20 = vpop.eup %1768  ;;  %v1227_v16 = vadd.f32 %v1226_v13, %v1178_v15 }
 0x23d   : > { %1262 = vst [vmem:[%s2390_s29 + $0x60] sm:$0xff] %v1769_v20 }
 0x23e   : > { %1770 = vtanh.f32 %v1227_v16 }
 0x241   : > { %v1180_v18 = vpop.f32.mrf.mxu2 }
 0x242   : > { %v1181_v21 = vadd.f32 %v2383_v12, %v1180_v18 }
 0x243   : > { %v1231_v26 = vpop.f32.mrf.mxu3 }
 0x244   : > { %v1771_v22 = vpop.eup %1770  ;;  %v1230_v19 = vadd.f32 %v1229_v17, %v1181_v21 }
 0x245   : > { %1263 = vst [vmem:[%s2390_s29 + $0x68] sm:$0xff] %v1771_v22 }
 0x246   : > { %1772 = vtanh.f32 %v1230_v19 }
 0x249   : > { %v1182_v23 = vpop.f32.mrf.mxu2 }
 0x24a   : > { %v1183_v25 = vadd.f32 %v2383_v12, %v1182_v23 }
 0x24c   : > { %v1773_v27 = vpop.eup %1772  ;;  %v1232_v28 = vadd.f32 %v1231_v26, %v1183_v25 }
 0x24d   : > { %1264 = vst [vmem:[%s2390_s29 + $0x70] sm:$0xff] %v1773_v27 }
 0x24e   : > { %1774 = vtanh.f32 %v1232_v28 }
 0x254   : > { %v1775_v29 = vpop.eup %1774 }
 0x255   : > { %1265 = vst [vmem:[%s2390_s29 + $0x78] sm:$0xff] %v1775_v29 }
 0x256   : > { %1863 = shalt.err (!%p1860_p8)
}
 0x257   : > { %s1912_s22 = smov 128   ;;  %s1913_s29 = smov 8  }
 0x258   : > { %1687 = dma.vmem_to_hbm [thread:$0]  (%p1992_p5), %s1280_s15, 2048, %s1282_s16, %s1267_s28, %s1912_s22, %s1912_s22, %s1913_s29  }
 0x259 PF: > { %p1704_p9 = scmp.ge.s32.totalorder %s1906_s27, 2  ;;  %s1296_s9 = sand.u32 1, %s1894_s24  }
 0x25a   : > { %s1297_s13 = scalar_lea.sflag [#allocation4], %s1296_s9 }
 0x25b   : > { %p1697_p10 = pnand %p1704_p9, %p1996_p6 }
 0x25d   : > { %p1698_p11 = pneg %p1697_p10 }
 0x25f   : > { %1889 = dma.done.wait (%p1698_p11), %s1297_s13, 2048  }
 0x260   : > { %1891 = vsyncadd (%p1698_p11), %s1297_s13, 4294965248  ;;  %p19_p12 = scmp.ge.s32.totalorder %s1979_s30, 4   ;;  %s2467_s24 = smov %s1898_s25 }
 0x261   : > { %s2468_s25 = smov %s1902_s26  ;;  %s2469_s26 = smov %s1990_s10 }
 0x262   : > { %s2470_s27 = smov %s1979_s30  ;;  %21 = sbr.rel (!%p19_p12) target bundleno = 5 (0x5), region = 92 }
 0x267   :  { %1303 = vsyncpa [#allocation3], 1 }
 0x268   :  { %1305 = vsyncpa [#allocation3 + $0x1], 1 }
 0x269   :  { %1306 = vsyncpa [#allocation6], 1 }
 0x26a   :  { %1307 = vsyncpa [#allocation4], 1 }
 0x26b   :  { %1309 = vsyncpa [#allocation4 + $0x1], 1 }

</bundles_post_ra>
